<compile_context>
chip_gen: v7x
topology: tpu7x:2x2x1
jax: 0.10.0
libtpu: 0.0.40
codegen_flags: <defaults>
</compile_context>

<pallas_src>
import jax
import jax.numpy as jnp
from jax import lax
from jax.experimental import pallas as pl
from jax.experimental.pallas import tpu as pltpu


def _stripe_attn_kernel(xq_ref, xk_ref, xv_ref, wq_ref, wk_ref, wv_ref, o_ref):
    # xq: [C, tq]  xk/xv: [C, HW]  wq/wk: [dimqk, C]  wv: [dimv, C]
    # o:  [dimv, tq]
    hw = xk_ref.shape[-1]

    xq = xq_ref[...]
    xk = xk_ref[...]
    xv = xv_ref[...]
    wq = wq_ref[...]          # softmax scale already folded in by the wrapper
    wk = wk_ref[...]
    wv = wv_ref[...]

    # 1x1-conv projections as [d, C] @ [C, n] matmuls. Operands are fed to the
    # MXU in their native dtype (bf16 stays bf16); results keep that dtype so
    # the follow-up matmuls also run at native MXU speed.
    qT = jnp.dot(wq, xq)      # [dimqk, tq]
    kT = jnp.dot(wk, xk)      # [dimqk, HW]
    vT = jnp.dot(wv, xv)      # [dimv,  HW]

    # logits[x, y] = <q_x, k_y>: contract dimqk on both operands (trans_a
    # matmul), no materialized transpose. Accumulate in f32.
    logits = lax.dot_general(
        qT, kT, dimension_numbers=(((0,), (0,)), ((), ())),
        preferred_element_type=jnp.float32)              # [tq, HW]

    # Max-stabilized softmax numerator; normalization deferred until after the
    # PV matmul so the VPU multiply is [dimv, tq] instead of [tq, HW].
    m = jnp.max(logits, axis=-1, keepdims=True)          # [tq, 1]
    p = jnp.exp(logits - m)                              # [tq, HW] f32

    # Row sums in lane-major layout ([1, tq]) via a tiny MXU matmul (keeps the
    # denominator in f32 and avoids any vreg relayout).
    denom = lax.dot_general(
        jnp.ones((1, hw), jnp.float32), p,
        dimension_numbers=(((1,), (1,)), ((), ())),
        preferred_element_type=jnp.float32)              # [1, tq]

    # out^T = v^T @ p^T -> [dimv, tq]; lane-dense along the query axis.
    outT = lax.dot_general(
        vT, p.astype(vT.dtype),
        dimension_numbers=(((1,), (1,)), ((), ())),
        preferred_element_type=jnp.float32)              # [dimv, tq]

    inv = pl.reciprocal(denom, approx=True)              # EUP slot, ~free
    o_ref[...] = (outT * inv).astype(o_ref.dtype)


def _pick_block_q(hw, max_q=512):
    """Largest q-tile that bounds the [tq, HW] logits in VMEM and respects the
    128-lane tiling constraint; falls back to the full extent."""
    if hw <= max_q:
        return hw
    bq = max_q - max_q % 128
    while bq >= 128:
        if hw % bq == 0:
            return bq
        bq -= 128
    return hw


def stripe_attention(query_nchw, key_nchw, value_nchw,
                     wq_conv, wk_conv, wv_conv, *, heads, dimqk, dimv):
    """Pallas implementation of StripeAttention.forward (prob=False).

    query/key/value: [B, C, H, W] (NCHW, like the PyTorch module)
    wq_conv/wk_conv: [heads*dimqk, C, 1, 1]  (Conv2d weight, bias=False)
    wv_conv:         [heads*dimv,  C, 1, 1]
    returns:         [B, heads*dimv, H, W]
    """
    B, C, H, W = query_nchw.shape
    HW = H * W
    scale = float(dimqk) ** (-0.5)

    # NCHW -> [B, C, HW] is a pure (free) reshape; no relayout.
    xq = query_nchw.reshape(B, C, HW)
    xk = key_nchw.reshape(B, C, HW)
    xv = value_nchw.reshape(B, C, HW)

    # Conv2d weight [h*d, C, 1, 1] -> [heads, d, C]; row h*d + i belongs to
    # head h. Softmax scale folded into wq once, on the host.
    wq = wq_conv.reshape(heads, dimqk, C) * scale
    wk = wk_conv.reshape(heads, dimqk, C)
    wv = wv_conv.reshape(heads, dimv, C)

    block_q = _pick_block_q(HW)
    num_q_tiles = HW // block_q

    xq_spec = pl.BlockSpec((None, C, block_q), lambda b, qt, h: (b, 0, qt))
    kv_spec = pl.BlockSpec((None, C, HW), lambda b, qt, h: (b, 0, 0))
    wqk_spec = pl.BlockSpec((None, dimqk, C), lambda b, qt, h: (h, 0, 0))
    wv_spec = pl.BlockSpec((None, dimv, C), lambda b, qt, h: (h, 0, 0))
    out_spec = pl.BlockSpec((None, None, dimv, block_q),
                            lambda b, qt, h: (b, h, 0, qt))

    out = pl.pallas_call(
        _stripe_attn_kernel,
        out_shape=jax.ShapeDtypeStruct((B, heads, dimv, HW), query_nchw.dtype),
        grid=(B, num_q_tiles, heads),
        in_specs=[xq_spec, kv_spec, kv_spec, wqk_spec, wqk_spec, wv_spec],
        out_specs=out_spec,
        compiler_params=pltpu.CompilerParams(
            dimension_semantics=("parallel", "parallel", "parallel"),
            vmem_limit_bytes=48 * 1024 * 1024),
    )(xq, xk, xv, wq, wk, wv)

    # [B, heads, dimv, HW] -> 'B (h d) H W' is a pure reshape (no transpose).
    return out.reshape(B, heads * dimv, H, W)


def _reference(query, key, value, wq_conv, wk_conv, wv_conv, *, heads, dimqk, dimv):
    """Pure-JAX reference mirroring the PyTorch forward (sanity check)."""
    B, C, H, W = query.shape
    scale = float(dimqk) ** (-0.5)

    def conv1x1(x, w):  # x: [B,C,H,W], w: [O,C,1,1] -> [B,O,H,W]
        return jnp.einsum('bchw,oc->bohw', x, w.reshape(w.shape[0], C))

    def split_heads(x, d):  # [B, h*d, H, W] -> [B, h, HW, d]
        return jnp.transpose(x.reshape(B, heads, d, H * W), (0, 1, 3, 2))

    q = split_heads(conv1x1(query, wq_conv), dimqk) * scale
    k = split_heads(conv1x1(key, wk_conv), dimqk)
    v = split_heads(conv1x1(value, wv_conv), dimv)
    logits = jnp.einsum('bhxd,bhyd->bhxy', q, k)
    weights = jax.nn.softmax(logits, axis=-1)
    out = jnp.einsum('bhxy,bhyd->bhxd', weights, v)
    out = jnp.transpose(out, (0, 1, 3, 2)).reshape(B, heads * dimv, H, W)
    return out


if __name__ == "__main__":
    # Small, deterministic config consistent with the module's __init__.
    B, C, H, W = 2, 4, 16, 16
    heads, dimqk, dimv = 2, 32, 32

    key = jax.random.PRNGKey(0)
    k_x, k_kf, k_vf, k_wq, k_wk, k_wv = jax.random.split(key, 6)

    query = jax.random.normal(k_x, (B, C, H, W), dtype=jnp.float32)
    key_f = jax.random.normal(k_kf, (B, C, H, W), dtype=jnp.float32)
    val_f = jax.random.normal(k_vf, (B, C, H, W), dtype=jnp.float32)

    # Deterministic synthetic Conv2d weights (bias=False), shapes from __init__.
    wq_conv = 0.1 * jax.random.normal(k_wq, (heads * dimqk, C, 1, 1), jnp.float32)
    wk_conv = 0.1 * jax.random.normal(k_wk, (heads * dimqk, C, 1, 1), jnp.float32)
    wv_conv = 0.1 * jax.random.normal(k_wv, (heads * dimv, C, 1, 1), jnp.float32)

    out = stripe_attention(query, key_f, val_f, wq_conv, wk_conv, wv_conv,
                           heads=heads, dimqk=dimqk, dimv=dimv)
    out = jax.block_until_ready(out)

    ref = _reference(query, key_f, val_f, wq_conv, wk_conv, wv_conv,
                     heads=heads, dimqk=dimqk, dimv=dimv)
    assert out.shape == (B, heads * dimv, H, W)
    # Slightly loose tolerance: approx reciprocal + deferred normalization +
    # native-dtype MXU feeds (exact to ~1e-3 for this f32 config).
    assert jnp.allclose(out, ref, atol=1e-2, rtol=1e-2)

    print("KERNEL_OK")
</pallas_src>

<mosaic_0001>
module attributes {stable_mosaic.version = 11 : i64} {
  func.func @_stripe_attn_kernel(%arg0: i32, %arg1: i32, %arg2: i32, %arg3: memref<1x4x256xf32, #tpu.memory_space<vmem>>, %arg4: memref<1x4x256xf32, #tpu.memory_space<vmem>>, %arg5: memref<1x4x256xf32, #tpu.memory_space<vmem>>, %arg6: memref<1x32x4xf32, #tpu.memory_space<vmem>>, %arg7: memref<1x32x4xf32, #tpu.memory_space<vmem>>, %arg8: memref<1x32x4xf32, #tpu.memory_space<vmem>>, %arg9: memref<1x1x32x256xf32, #tpu.memory_space<vmem>>) attributes {dimension_semantics = [#tpu.dimension_semantics<parallel>, #tpu.dimension_semantics<parallel>, #tpu.dimension_semantics<parallel>], iteration_bounds = array<i64: 2, 1, 2>, scalar_prefetch = 0 : i64, scratch_operands = 0 : i64, tpu.core_type = #tpu.core_type<tc>, window_params = [{transform_indices = @transform_0, window_bounds = array<i64: 1, 4, 256>}, {transform_indices = @transform_1, window_bounds = array<i64: 1, 4, 256>}, {transform_indices = @transform_2, window_bounds = array<i64: 1, 4, 256>}, {transform_indices = @transform_3, window_bounds = array<i64: 1, 32, 4>}, {transform_indices = @transform_4, window_bounds = array<i64: 1, 32, 4>}, {transform_indices = @transform_5, window_bounds = array<i64: 1, 32, 4>}, {transform_indices = @transform_6, window_bounds = array<i64: 1, 1, 32, 256>}]} {
    %c0 = arith.constant 0 : index
    %c0_0 = arith.constant 0 : index
    %c0_1 = arith.constant 0 : index
    %0 = vector.load %arg3[%c0, %c0_0, %c0_1] : memref<1x4x256xf32, #tpu.memory_space<vmem>>, vector<1x4x256xf32>
    %1 = vector.shape_cast %0 : vector<1x4x256xf32> to vector<4x256xf32>
    %c0_2 = arith.constant 0 : index
    %c0_3 = arith.constant 0 : index
    %c0_4 = arith.constant 0 : index
    %2 = vector.load %arg4[%c0_2, %c0_3, %c0_4] : memref<1x4x256xf32, #tpu.memory_space<vmem>>, vector<1x4x256xf32>
    %3 = vector.shape_cast %2 : vector<1x4x256xf32> to vector<4x256xf32>
    %c0_5 = arith.constant 0 : index
    %c0_6 = arith.constant 0 : index
    %c0_7 = arith.constant 0 : index
    %4 = vector.load %arg5[%c0_5, %c0_6, %c0_7] : memref<1x4x256xf32, #tpu.memory_space<vmem>>, vector<1x4x256xf32>
    %5 = vector.shape_cast %4 : vector<1x4x256xf32> to vector<4x256xf32>
    %c0_8 = arith.constant 0 : index
    %c0_9 = arith.constant 0 : index
    %c0_10 = arith.constant 0 : index
    %6 = vector.load %arg6[%c0_8, %c0_9, %c0_10] : memref<1x32x4xf32, #tpu.memory_space<vmem>>, vector<1x32x4xf32>
    %7 = vector.shape_cast %6 : vector<1x32x4xf32> to vector<32x4xf32>
    %c0_11 = arith.constant 0 : index
    %c0_12 = arith.constant 0 : index
    %c0_13 = arith.constant 0 : index
    %8 = vector.load %arg7[%c0_11, %c0_12, %c0_13] : memref<1x32x4xf32, #tpu.memory_space<vmem>>, vector<1x32x4xf32>
    %9 = vector.shape_cast %8 : vector<1x32x4xf32> to vector<32x4xf32>
    %c0_14 = arith.constant 0 : index
    %c0_15 = arith.constant 0 : index
    %c0_16 = arith.constant 0 : index
    %10 = vector.load %arg8[%c0_14, %c0_15, %c0_16] : memref<1x32x4xf32, #tpu.memory_space<vmem>>, vector<1x32x4xf32>
    %11 = vector.shape_cast %10 : vector<1x32x4xf32> to vector<32x4xf32>
    %cst = arith.constant dense<0.000000e+00> : vector<32x256xf32>
    %12 = tpu.matmul %7, %1, %cst {dimension_numbers = #tpu.dot_dimension_numbers<[1], [0], [0], [1], [0, 0, 1, 1], [], []>} : vector<32x4xf32>, vector<4x256xf32>, vector<32x256xf32> -> vector<32x256xf32>
    %cst_17 = arith.constant dense<0.000000e+00> : vector<32x256xf32>
    %13 = tpu.matmul %9, %3, %cst_17 {dimension_numbers = #tpu.dot_dimension_numbers<[1], [0], [0], [1], [0, 0, 1, 1], [], []>} : vector<32x4xf32>, vector<4x256xf32>, vector<32x256xf32> -> vector<32x256xf32>
    %cst_18 = arith.constant dense<0.000000e+00> : vector<32x256xf32>
    %14 = tpu.matmul %11, %5, %cst_18 {dimension_numbers = #tpu.dot_dimension_numbers<[1], [0], [0], [1], [0, 0, 1, 1], [], []>} : vector<32x4xf32>, vector<4x256xf32>, vector<32x256xf32> -> vector<32x256xf32>
    %cst_19 = arith.constant dense<0.000000e+00> : vector<256x256xf32>
    %15 = tpu.matmul %12, %13, %cst_19 {dimension_numbers = #tpu.dot_dimension_numbers<[0], [0], [1], [1], [0, 1, 1, 1], [], []>} : vector<32x256xf32>, vector<32x256xf32>, vector<256x256xf32> -> vector<256x256xf32>
    %cst_20 = arith.constant dense<0xFF800000> : vector<256xf32>
    %16 = vector.multi_reduction <maximumf>, %15, %cst_20 [1] : vector<256x256xf32> to vector<256xf32>
    %17 = vector.shape_cast %16 : vector<256xf32> to vector<256x1xf32>
    %18 = vector.broadcast %17 : vector<256x1xf32> to vector<256x256xf32>
    %19 = arith.subf %15, %18 : vector<256x256xf32>
    %20 = math.exp %19 : vector<256x256xf32>
    %cst_21 = arith.constant 1.000000e+00 : f32
    %21 = vector.broadcast %cst_21 : f32 to vector<1x256xf32>
    %cst_22 = arith.constant dense<0.000000e+00> : vector<1x256xf32>
    %22 = tpu.matmul %21, %20, %cst_22 {dimension_numbers = #tpu.dot_dimension_numbers<[1], [1], [0], [0], [0, 0, 1, 0], [], []>} : vector<1x256xf32>, vector<256x256xf32>, vector<1x256xf32> -> vector<1x256xf32>
    %cst_23 = arith.constant dense<0.000000e+00> : vector<32x256xf32>
    %23 = tpu.matmul %14, %20, %cst_23 {dimension_numbers = #tpu.dot_dimension_numbers<[1], [1], [0], [0], [0, 0, 1, 0], [], []>} : vector<32x256xf32>, vector<256x256xf32>, vector<32x256xf32> -> vector<32x256xf32>
    %24 = tpu.reciprocal %22 {approx = true} : vector<1x256xf32> -> vector<1x256xf32>
    %25 = vector.broadcast %24 : vector<1x256xf32> to vector<32x256xf32>
    %26 = arith.mulf %23, %25 : vector<32x256xf32>
    %c0_24 = arith.constant 0 : index
    %c0_25 = arith.constant 0 : index
    %c0_26 = arith.constant 0 : index
    %c0_27 = arith.constant 0 : index
    %27 = vector.load %arg9[%c0_24, %c0_25, %c0_26, %c0_27] : memref<1x1x32x256xf32, #tpu.memory_space<vmem>>, vector<1x1x32x256xf32>
    %28 = vector.shape_cast %27 : vector<1x1x32x256xf32> to vector<32x256xf32>
    %29 = vector.shape_cast %26 : vector<32x256xf32> to vector<1x1x32x256xf32>
    tpu.vector_store %arg9[%c0_24, %c0_25, %c0_26, %c0_27], %29 {strides = array<i32>} : memref<1x1x32x256xf32, #tpu.memory_space<vmem>>, vector<1x1x32x256xf32>,
    return
  }
  func.func @transform_0(%arg0: i32, %arg1: i32, %arg2: i32) -> (i32, i32, i32) {
    %c0_i32 = arith.constant 0 : i32
    %c0_i32_0 = arith.constant 0 : i32
    return %arg0, %c0_i32, %arg1 : i32, i32, i32
  }
  func.func @transform_1(%arg0: i32, %arg1: i32, %arg2: i32) -> (i32, i32, i32) {
    %c0_i32 = arith.constant 0 : i32
    %c0_i32_0 = arith.constant 0 : i32
    %c0_i32_1 = arith.constant 0 : i32
    return %arg0, %c0_i32, %c0_i32_0 : i32, i32, i32
  }
  func.func @transform_2(%arg0: i32, %arg1: i32, %arg2: i32) -> (i32, i32, i32) {
    %c0_i32 = arith.constant 0 : i32
    %c0_i32_0 = arith.constant 0 : i32
    %c0_i32_1 = arith.constant 0 : i32
    return %arg0, %c0_i32, %c0_i32_0 : i32, i32, i32
  }
  func.func @transform_3(%arg0: i32, %arg1: i32, %arg2: i32) -> (i32, i32, i32) {
    %c0_i32 = arith.constant 0 : i32
    %c0_i32_0 = arith.constant 0 : i32
    %c0_i32_1 = arith.constant 0 : i32
    return %arg2, %c0_i32, %c0_i32_0 : i32, i32, i32
  }
  func.func @transform_4(%arg0: i32, %arg1: i32, %arg2: i32) -> (i32, i32, i32) {
    %c0_i32 = arith.constant 0 : i32
    %c0_i32_0 = arith.constant 0 : i32
    %c0_i32_1 = arith.constant 0 : i32
    return %arg2, %c0_i32, %c0_i32_0 : i32, i32, i32
  }
  func.func @transform_5(%arg0: i32, %arg1: i32, %arg2: i32) -> (i32, i32, i32) {
    %c0_i32 = arith.constant 0 : i32
    %c0_i32_0 = arith.constant 0 : i32
    %c0_i32_1 = arith.constant 0 : i32
    return %arg2, %c0_i32, %c0_i32_0 : i32, i32, i32
  }
  func.func @transform_6(%arg0: i32, %arg1: i32, %arg2: i32) -> (i32, i32, i32, i32) {
    %c0_i32 = arith.constant 0 : i32
    %c0_i32_0 = arith.constant 0 : i32
    return %arg0, %arg2, %c0_i32, %arg1 : i32, i32, i32, i32
  }
}

</mosaic_0001>

<bundles_post_ra>
// kernel: tpu_custom_call.1
= control target key start
LH: loop header
LB: loop body
LE: loop exit
PB: predicated region body
PF: predicated region fallthrough
CT: control target
= control target key end

     0   :  { %11 = vsyncpa [#allocation3], 0  ;;  %s2893_s0 = inlined_call_operand.vmem [shape: f32[2,4,256], index: 0, kind: input, shape index: {}]   ;;  %s2894_s1 = inlined_call_operand.vmem [shape: f32[2,4,256], index: 1, kind: input, shape index: {}]   ;;  %s2895_s2 = inlined_call_operand.vmem [shape: f32[2,4,256], index: 2, kind: input, shape index: {}]   ;;  %s2896_s3 = inlined_call_operand.vmem [shape: f32[2,32,4], index: 3, kind: input, shape index: {}]   ;;  %s2897_s4 = inlined_call_operand.vmem [shape: f32[2,32,4], index: 4, kind: input, shape index: {}]   ;;  %s2898_s5 = inlined_call_operand.vmem [shape: f32[2,32,4], index: 5, kind: input, shape index: {}]   ;;  %s2899_s6 = inlined_call_operand.hbm [shape: f32[2,2,32,256], index: 6, kind: output, shape index: {}]  }
   0x1   :  { %13 = vsyncpa [#allocation3 + $0x1], 0  ;;  %s2349_s21 = smov 0   ;;  %s2351_s22 = smov 0  }
   0x2   :  { %s2353_s23 = smov 0   ;;  %s2355_s24 = smov 0  }
   0x3   :  { %s2357_s25 = smov 0   ;;  %s2359_s26 = smov 0  }
   0x4   :  { %s2361_s27 = smov 0   ;;  %s2363_s28 = smov 0  }
   0x5 LB: > { %s1785_s29 = sadd.s32 4294967295, %s2307_s28   ;;  %s1786_s30 = sadd.s32 4294967294, %s2307_s28   ;;  %s2307_s28 = sphi %s2363_s28, %s19_s28   ;;  %s2303_s27 = sphi %s2361_s27, %s2950_s27   ;;  %s2299_s26 = sphi %s2359_s26, %s2949_s26   ;;  %s2295_s25 = sphi %s2357_s25, %s2948_s25   ;;  %s2291_s24 = sphi %s2355_s24, %s2947_s24   ;;  %s2287_s23 = sphi %s2353_s23, %s2946_s23   ;;  %s2283_s22 = sphi %s2351_s22, %s2945_s22   ;;  %s2279_s21 = sphi %s2349_s21, %s2944_s21  }
   0x6   : > { %s31_s7 = sadd.s32 1, %s2299_s26  ;;  %s38_s8 = sadd.s32 1, %s2303_s27 }
   0x7   : > { %p32_p0 = scmp.ge.s32.totalorder %s31_s7, 2  ;;  %p217_p1 = scmp.ne.s32.totalorder %s2287_s23, %s2283_s22 }
   0x8   : > { %p218_p2 = scmp.eq.s32.totalorder %s1785_s29, 3  ;;  %p223_p5 = scmp.ne.s32.totalorder %s2283_s22, %s2279_s21 }
   0x9   : > { %s2952_s7 = smov (%p32_p0, %s31_s7), 0  ;;  %s2954_s8 = smov (!%p32_p0, %s38_s8), %s2303_s27 }
   0xa   : > { %s201_s9 = ssub.s32 %s2299_s26, %s2952_s7  ;;  %p2400_p3 = por %p218_p2, %p217_p1 }
   0xb   : > { %p40_p4 = scmp.ge.s32.totalorder %s2954_s8, 2  ;;  %p224_p6 = scmp.eq.s32.totalorder %s1786_s30, 3 }
   0xc   : > { %p1789_p7 = scmp.ge.s32.totalorder %s2307_s28, 1  ;;  %p295_p9 = scmp.lt.s32.totalorder %s2307_s28, 5 }
   0xd   : > { %s2956_s8 = smov (%p40_p4, %s2954_s8), 0  ;;  %p2409_p8 = por %p224_p6, %p223_p5 }
   0xe   : > { %2915 = sst [smem:[#allocation5_spill]] %s2956_s8  ;;  %s200_s12 = ssub.s32 %s2303_s27, %s2956_s8 }
   0xf   : > { %s207_s13 = sadd.s32 1, %s2287_s23  ;;  %s202_s14 = sor.u32 %s201_s9, %s200_s12 }
  0x10   : > { %p296_p10 = pnand %p1789_p7, %p295_p9  ;;  %p205_p11 = scmp.eq.s32.totalorder %s202_s14, 0 }
  0x12   : > { %s2418_s15 = scalar_select %p205_p11, %s2287_s23, %s207_s13  }
  0x13   : > { %299 = sbr.rel (%p296_p10) target bundleno = 1130 (0x46a), region = 44 }
  0x1a   : > { %p355_p12 = scmp.lt.s32.totalorder %s2295_s25, 1  ;;  %p374_p13 = scmp.lt.s32.totalorder %s2291_s24, 1  ;;  %v2309_v0 = vmov 0.0   ;;  %vm420_vm0 = vcmask 1043456   ;;  %vm407_vm1 = vcmask 31744   ;;  %vm792_vm2 = vcmask 261120  }
  0x1b   : > { %489 = vmatprep.mubr.f32.mxu0 %v2309_v0  ;;  %608 = vmatprep.mubr.f32.mxu1 %v2309_v0  ;;  %s1855_s19 = sshll.u32 %s2295_s25, 4 }
  0x1c   : > { %s356_s16 = scalar_select %p355_p12, %s2295_s25, 1 }
  0x1d   : > { %s375_s17 = scalar_select %p374_p13, %s2291_s24, 1 }
  0x1e   : > { %s2426_s18 = sshll.u32 %s356_s16, 3  ;;  %s1854_s16 = sshll.u32 %s2291_s24, 3 }
  0x1f   : > { %s362_s29 = scalar_lea.vmem %s2893_s0, %s2426_s18  ;;  %s368_s12 = scalar_lea.vmem %s2894_s1, %s2426_s18 }
  0x20   : > { %v390_v1 = vld [vmem:[%s362_s29] sm:$0xff]  ;;  %s2436_s13 = sshll.u32 %s375_s17, 5  ;;  %s373_s30 = scalar_lea.vmem %s2895_s2, %s2426_s18 }
  0x21   : > { %v391_v2 = vld [vmem:[%s368_s12] sm:$0xff]  ;;  %v406_v3 = vcombine.high %v390_v1, %v390_v1  ;;  %s378_s8 = scalar_lea.vmem %s2896_s3, %s2436_s13  ;;  %s383_s29 = scalar_lea.vmem %s2897_s4, %s2436_s13 }
  0x22   : > { %v515_v4 = vcombine.high %v391_v2, %v391_v2  ;;  %v393_v5 = vld [vmem:[%s378_s8] sm:$0xff]  ;;  %v399_v6 = vld [vmem:[%s383_s29 + $0x10] sm:$0xff]  ;;  %v394_v7 = vld [vmem:[%s378_s8 + $0x8] sm:$0xff]  ;;  %s388_s14 = scalar_lea.vmem %s2898_s5, %s2436_s13  ;;  %s351_s18 = sand.u32 1, %s2283_s22  }
  0x23   : > { %1803 = vmatprep.subr.msk.mxu0 %vm420_vm0, %v406_v3  ;;  %v400_v8 = vld [vmem:[%s383_s29 + $0x18] sm:$0xff]  ;;  %v395_v9 = vld [vmem:[%s378_s8 + $0x10] sm:$0xff]  ;;  %v397_v11 = vld [vmem:[%s383_s29] sm:$0xff]  ;;  %s1790_s13 = sshll.u32 %s351_s18, 6  ;;  %s1635_s20 = sadd.s32 %s1855_s19, %s1854_s16 }
  0x24   : > { %2001 = vmatprep.subr.msk.mxu1 %vm420_vm0, %v515_v4  ;;  %1804 = vmatpush1.msk.msra.mxu0 %vm420_vm0, %v390_v1  ;;  %v396_v10 = vld [vmem:[%s378_s8 + $0x18] sm:$0xff]  ;;  %v398_v12 = vld [vmem:[%s383_s29 + $0x8] sm:$0xff]  ;;  %s1856_s29 = sshll.u32 %s1635_s20, 7  ;;  %s353_s8 = scalar_lea.vmem [#allocation2], %s1790_s13 }
  0x25   : > { %2002 = vmatpush1.msk.msra.mxu1 %vm420_vm0, %v391_v2  ;;  %1805 = vmatmul.mubr.msk.f32.vlgmr.msra.gmra.mrb[0].mxu0 %vm407_vm1, %v393_v5  ;;  %v402_v5 = vld [vmem:[%s388_s14 + $0x8] sm:$0xff]  ;;  %s1638_s17 = sshll.u32 %s353_s8, 4  ;;  %s2841_s9 = scalar_lea.sflag [#allocation3], %s351_s18  ;;  %s2837_s17 = int_to_ptr.vmem [resolvable:$true] %s1638_s17 }
  0x26   : > { %1809 = vmatprep.subr.msk.mxu0 %vm420_vm0, %v515_v4  ;;  %495 = vmatprep.mubr.f32.mxu0 %v2309_v0  ;;  %v401_v4 = vld [vmem:[%s388_s14] sm:$0xff]  ;;  %s2213_s12 = scalar_lea.vmem %s2837_s17, 1024 }
  0x27   : > { %1810 = vmatpush1.msk.msra.mxu0 %vm420_vm0, %v391_v2  ;;  %1813 = vmatmul.mubr.msk.f32.vlgmr.msra.gmra.mrb[0].mxu1 %vm407_vm1, %v399_v6  ;;  %v392_v2 = vld [vmem:[%s373_s30] sm:$0xff]  ;;  %v403_v6 = vld [vmem:[%s388_s14 + $0x10] sm:$0xff]  ;;  %s2835_s30 = scalar_lea.hbm %s2899_s6, %s1856_s29  ;;  %p2214_p0 = scmp.ne.s32.totalorder %s2837_s17, %s2213_s12 }
  0x28   : > { %614 = vmatprep.mubr.f32.mxu1 %v2309_v0  ;;  %v622_v3 = vcombine.high %v392_v2, %v392_v2 }
  0x29   : > { %1806 = vmatmul.mubr.msk.f32.gmra.mrb[2].mxu0 %vm407_vm1, %v394_v7  ;;  %v404_v7 = vld [vmem:[%s388_s14 + $0x18] sm:$0xff]  ;;  %p2215_p1 = pnand %p2214_p0, %p2400_p3  ;;  %s2311_s14 = smov [#allocation2]  }
  0x2a   : > { %501 = vmatprep.mubr.f32.mxu0 %v2309_v0  ;;  %1815 = vmatprep.subr.msk.mxu0 %vm420_vm0, %v622_v3  ;;  %s2217_s13 = sshll.u32 %s2311_s14, 4  ;;  %s2218_s13 = int_to_ptr.vmem [resolvable:$false] %s2217_s13 }
  0x2b   : > { %1814 = vmatmul.mubr.msk.f32.gmra.mrb[2].mxu1 %vm407_vm1, %v400_v8  ;;  %p2216_p2 = pneg %p2215_p1  ;;  %s2219_s16 = scalar_lea.vmem %s2218_s13, 2048 }
  0x2c   : > { %953 = vmatprep.mubr.f32.mxu1 %v2309_v0  ;;  %p2220_p4 = scmp.lt.s32.totalorder %s2837_s17, %s2218_s13  ;;  %p2221_p5 = scmp.lt.s32.totalorder %s2219_s16, %s2213_s12 }
  0x2d   : > { %1807 = vmatmul.mubr.msk.f32.gmra.mrb[4].mxu0 %vm407_vm1, %v395_v9 }
  0x2e   : > { %507 = vmatprep.mubr.f32.mxu0 %v2309_v0  ;;  %p2222_p6 = por %p2221_p5, %p2220_p4 }
  0x30   : > { %p2223_p7 = pnand %p2222_p6, %p2216_p2 }
  0x31   : > { %1808 = vmatmul.mubr.msk.f32.gmra.mrb[6].mxu0 %vm407_vm1, %v396_v10 }
  0x32   : > { %596 = vmatprep.mubr.f32.mxu0 %v2309_v0 }
  0x35   : > { %1811 = vmatmul.mubr.msk.f32.vlgmr.msra.gmra.mrb[8].mxu0 %vm407_vm1, %v397_v11 }
  0x36   : > { %602 = vmatprep.mubr.f32.mxu0 %v2309_v0  ;;  %1816 = vmatpush1.msk.msra.mxu0 %vm420_vm0, %v392_v2 }
  0x39   : > { %1812 = vmatmul.mubr.msk.f32.gmra.mrb[10].mxu0 %vm407_vm1, %v398_v12 }
  0x3a   : > { %703 = vmatprep.mubr.f32.mxu0 %v2309_v0 }
  0x3d   : > { %1817 = vmatmul.mubr.msk.f32.vlgmr.msra.gmra.mrb[12].mxu0 %vm407_vm1, %v401_v4 }
  0x3e   : > { %709 = vmatprep.mubr.f32.mxu0 %v2309_v0 }
  0x41   : > { %1818 = vmatmul.mubr.msk.f32.gmra.mrb[14].mxu0 %vm407_vm1, %v402_v5 }
  0x42   : > { %715 = vmatprep.mubr.f32.mxu0 %v2309_v0 }
  0x45   : > { %1819 = vmatmul.mubr.msk.f32.gmra.mrb[16].mxu0 %vm407_vm1, %v403_v6 }
  0x46   : > { %721 = vmatprep.mubr.f32.mxu0 %v2309_v0 }
  0x49   : > { %1820 = vmatmul.mubr.msk.f32.gmra.mrb[18].mxu0 %vm407_vm1, %v404_v7 }
  0xf8   : > { %v491_v13 = vpop.f32.mrb[0].mxu0 }
  0xf9   : > { %728 = vxpose.xlu0.b32.start [1/4] (short) %v491_v13, 128  ;;  %v493_v14 = vpop.f32.mrb[1].mxu0 }
  0xfa   : > { %760 = vxpose.xlu1.b32.start [1/4] (short) %v493_v14, 128  ;;  %v610_v15 = vpop.f32.mrb[0].mxu1 }
  0xfb   : > { %v612_v16 = vpop.f32.mrb[1].mxu1 }
  0xfc   : > { %v497_v17 = vpop.f32.mrb[2].mxu0 }
  0xfd   : > { %729 = vxpose.xlu0.b32.cont [2/4] (short) %v497_v17, 128  ;;  %v499_v18 = vpop.f32.mrb[3].mxu0 }
  0xfe   : > { %761 = vxpose.xlu1.b32.cont [2/4] (short) %v499_v18, 128  ;;  %v616_v19 = vpop.f32.mrb[2].mxu1 }
  0xff   : > { %v1871_v20 = vpack.c.bf16 %v616_v19, %v610_v15  ;;  %v618_v21 = vpop.f32.mrb[3].mxu1 }
 0x100   : > { %v503_v22 = vpop.f32.mrb[4].mxu0  ;;  %v1869_v23 = vpack.c.bf16 %v618_v21, %v612_v16 }
 0x101   : > { %730 = vxpose.xlu0.b32.cont [3/4] (short) %v503_v22, 128  ;;  %v505_v24 = vpop.f32.mrb[5].mxu0 }
 0x102   : > { %762 = vxpose.xlu1.b32.cont [3/4] (short) %v505_v24, 128 }
 0x104   : > { %v509_v25 = vpop.f32.mrb[6].mxu0 }
 0x105   : > { %731 = vxpose.xlu0.b32.end [4/4] (short) %v509_v25, 128  ;;  %v511_v26 = vpop.f32.mrb[7].mxu0 }
 0x106   : > { %763 = vxpose.xlu1.b32.end [4/4] (short) %v511_v26, 128 }
 0x108   : > { %v598_v27 = vpop.f32.mrb[8].mxu0 }
 0x109   : > { %v600_v28 = vpop.f32.mrb[9].mxu0 }
 0x10c   : > { %v604_v29 = vpop.f32.mrb[10].mxu0 }
 0x10d   : > { %v1867_v30 = vpack.c.bf16 %v604_v29, %v598_v27  ;;  %v606_v31 = vpop.f32.mrb[11].mxu0 }
 0x10e   : > { %v1865_v32 = vpack.c.bf16 %v606_v31, %v600_v28 }
 0x110   : > { %1866 = vmatprep.subr.bf16.mxu1 %v1865_v32 }
 0x111   : > { %1868 = vmatpush1.bf16.msra.mxu1 %v1867_v30 }
 0x112   : > { %1870 = vmatprep.subr.bf16.mxu1 %v1869_v23 }
 0x115   : > { %1872 = vmatpush1.bf16.msra.mxu1 %v1871_v20 }
 0x179   : > { %v744_v33 = vpop.trf.xlu0 }
 0x17a   : > { %1821 = vmatmul.mubr.msk.f32.vlgmr.msra.gmra.mrb[4].mxu1 %vm792_vm2, %v744_v33  ;;  %v776_v42 = vpop.trf.xlu1 }
 0x17b   : > { %959 = vmatprep.mubr.f32.mxu1 %v2309_v0 }
 0x17d   : > { %v745_v34 = vpop.trf.xlu0 }
 0x17e   : > { %1822 = vmatmul.mubr.msk.f32.gmra.mrb[6].mxu1 %vm792_vm2, %v745_v34  ;;  %v777_v44 = vpop.trf.xlu1 }
 0x17f   : > { %965 = vmatprep.mubr.f32.mxu1 %v2309_v0 }
 0x181   : > { %v746_v35 = vpop.trf.xlu0 }
 0x182   : > { %1823 = vmatmul.mubr.msk.f32.gmra.mrb[8].mxu1 %vm792_vm2, %v746_v35  ;;  %v778_v47 = vpop.trf.xlu1 }
 0x183   : > { %971 = vmatprep.mubr.f32.mxu1 %v2309_v0 }
 0x185   : > { %v747_v36 = vpop.trf.xlu0 }
 0x186   : > { %1824 = vmatmul.mubr.msk.f32.gmra.mrb[10].mxu1 %vm792_vm2, %v747_v36  ;;  %v779_v49 = vpop.trf.xlu1 }
 0x187   : > { %977 = vmatprep.mubr.f32.mxu1 %v2309_v0 }
 0x189   : > { %v748_v37 = vpop.trf.xlu0 }
 0x18a   : > { %1825 = vmatmul.mubr.msk.f32.gmra.mrb[12].mxu1 %vm792_vm2, %v748_v37  ;;  %v780_v52 = vpop.trf.xlu1 }
 0x18b   : > { %983 = vmatprep.mubr.f32.mxu1 %v2309_v0 }
 0x18d   : > { %v749_v38 = vpop.trf.xlu0 }
 0x18e   : > { %1826 = vmatmul.mubr.msk.f32.gmra.mrb[14].mxu1 %vm792_vm2, %v749_v38  ;;  %v781_v54 = vpop.trf.xlu1 }
 0x18f   : > { %989 = vmatprep.mubr.f32.mxu1 %v2309_v0 }
 0x191   : > { %v750_v39 = vpop.trf.xlu0 }
 0x192   : > { %1827 = vmatmul.mubr.msk.f32.gmra.mrb[16].mxu1 %vm792_vm2, %v750_v39  ;;  %v782_v55 = vpop.trf.xlu1 }
 0x193   : > { %995 = vmatprep.mubr.f32.mxu1 %v2309_v0 }
 0x195   : > { %v751_v40 = vpop.trf.xlu0 }
 0x196   : > { %1828 = vmatmul.mubr.msk.f32.gmra.mrb[18].mxu1 %vm792_vm2, %v751_v40  ;;  %v783_v56 = vpop.trf.xlu1 }
 0x197   : > { %1001 = vmatprep.mubr.f32.mxu1 %v2309_v0 }
 0x199   : > { %v752_v41 = vpop.trf.xlu0 }
 0x19a   : > { %1829 = vmatmul.mubr.msk.f32.gmra.mrb[20].mxu1 %vm792_vm2, %v752_v41  ;;  %v784_v57 = vpop.trf.xlu1 }
 0x19b   : > { %1007 = vmatprep.mubr.f32.mxu1 %v2309_v0 }
 0x19d   : > { %v753_v43 = vpop.trf.xlu0 }
 0x19e   : > { %1830 = vmatmul.mubr.msk.f32.gmra.mrb[22].mxu1 %vm792_vm2, %v753_v43  ;;  %v785_v58 = vpop.trf.xlu1 }
 0x19f   : > { %1013 = vmatprep.mubr.f32.mxu1 %v2309_v0 }
 0x1a1   : > { %v754_v45 = vpop.trf.xlu0 }
 0x1a2   : > { %1831 = vmatmul.mubr.msk.f32.gmra.mrb[24].mxu1 %vm792_vm2, %v754_v45  ;;  %v786_v59 = vpop.trf.xlu1 }
 0x1a3   : > { %1019 = vmatprep.mubr.f32.mxu1 %v2309_v0 }
 0x1a5   : > { %v755_v46 = vpop.trf.xlu0 }
 0x1a6   : > { %1832 = vmatmul.mubr.msk.f32.gmra.mrb[26].mxu1 %vm792_vm2, %v755_v46  ;;  %v787_v60 = vpop.trf.xlu1 }
 0x1a7   : > { %1025 = vmatprep.mubr.f32.mxu1 %v2309_v0 }
 0x1a9   : > { %v756_v48 = vpop.trf.xlu0 }
 0x1aa   : > { %1833 = vmatmul.mubr.msk.f32.gmra.mrb[28].mxu1 %vm792_vm2, %v756_v48  ;;  %v788_v61 = vpop.trf.xlu1 }
 0x1ab   : > { %1031 = vmatprep.mubr.f32.mxu1 %v2309_v0 }
 0x1ad   : > { %v757_v50 = vpop.trf.xlu0 }
 0x1ae   : > { %1834 = vmatmul.mubr.msk.f32.gmra.mrb[30].mxu1 %vm792_vm2, %v757_v50  ;;  %v789_v62 = vpop.trf.xlu1 }
 0x1af   : > { %1037 = vmatprep.mubr.f32.mxu1 %v2309_v0 }
 0x1b1   : > { %v758_v51 = vpop.trf.xlu0 }
 0x1b2   : > { %1835 = vmatmul.mubr.msk.f32.gmra.mrb[32].mxu1 %vm792_vm2, %v758_v51  ;;  %v790_v63 = vpop.trf.xlu1 }
 0x1b3   : > { %1043 = vmatprep.mubr.f32.mxu1 %v2309_v0 }
 0x1b5   : > { %v759_v53 = vpop.trf.xlu0 }
 0x1b6   : > { %1836 = vmatmul.mubr.msk.f32.gmra.mrb[34].mxu1 %vm792_vm2, %v759_v53  ;;  %v791_v1 = vpop.trf.xlu1 }
 0x1b7   : > { %1049 = vmatprep.mubr.f32.mxu1 %v2309_v0 }
 0x1ba   : > { %1837 = vmatmul.mubr.msk.f32.gmra.mrb[36].mxu1 %vm792_vm2, %v776_v42 }
 0x1bb   : > { %1055 = vmatprep.mubr.f32.mxu1 %v2309_v0 }
 0x1be   : > { %1838 = vmatmul.mubr.msk.f32.gmra.mrb[38].mxu1 %vm792_vm2, %v777_v44 }
 0x1bf   : > { %1061 = vmatprep.mubr.f32.mxu1 %v2309_v0 }
 0x1c2   : > { %1839 = vmatmul.mubr.msk.f32.gmra.mrb[40].mxu1 %vm792_vm2, %v778_v47 }
 0x1c3   : > { %1067 = vmatprep.mubr.f32.mxu1 %v2309_v0 }
 0x1c6   : > { %1840 = vmatmul.mubr.msk.f32.gmra.mrb[42].mxu1 %vm792_vm2, %v779_v49 }
 0x1c7   : > { %1073 = vmatprep.mubr.f32.mxu1 %v2309_v0 }
 0x1ca   : > { %1841 = vmatmul.mubr.msk.f32.gmra.mrb[44].mxu1 %vm792_vm2, %v780_v52 }
 0x1cb   : > { %1079 = vmatprep.mubr.f32.mxu1 %v2309_v0 }
 0x1ce   : > { %1842 = vmatmul.mubr.msk.f32.gmra.mrb[46].mxu1 %vm792_vm2, %v781_v54 }
 0x1cf   : > { %1085 = vmatprep.mubr.f32.mxu1 %v2309_v0 }
 0x1d2   : > { %1843 = vmatmul.mubr.msk.f32.gmra.mrb[48].mxu1 %vm792_vm2, %v782_v55 }
 0x1d3   : > { %1091 = vmatprep.mubr.f32.mxu1 %v2309_v0 }
 0x1d6   : > { %1844 = vmatmul.mubr.msk.f32.gmra.mrb[50].mxu1 %vm792_vm2, %v783_v56 }
 0x1d7   : > { %1097 = vmatprep.mubr.f32.mxu1 %v2309_v0 }
 0x1da   : > { %1845 = vmatmul.mubr.msk.f32.gmra.mrb[52].mxu1 %vm792_vm2, %v784_v57 }
 0x1db   : > { %1103 = vmatprep.mubr.f32.mxu1 %v2309_v0 }
 0x1de   : > { %1846 = vmatmul.mubr.msk.f32.gmra.mrb[54].mxu1 %vm792_vm2, %v785_v58 }
 0x1df   : > { %1109 = vmatprep.mubr.f32.mxu1 %v2309_v0 }
 0x1e2   : > { %1847 = vmatmul.mubr.msk.f32.gmra.mrb[56].mxu1 %vm792_vm2, %v786_v59 }
 0x1e3   : > { %1115 = vmatprep.mubr.f32.mxu1 %v2309_v0 }
 0x1e6   : > { %1848 = vmatmul.mubr.msk.f32.gmra.mrb[58].mxu1 %vm792_vm2, %v787_v60 }
 0x1e7   : > { %1121 = vmatprep.mubr.f32.mxu1 %v2309_v0 }
 0x1ea   : > { %1849 = vmatmul.mubr.msk.f32.gmra.mrb[60].mxu1 %vm792_vm2, %v788_v61 }
 0x1eb   : > { %1127 = vmatprep.mubr.f32.mxu1 %v2309_v0 }
 0x1ee   : > { %1850 = vmatmul.mubr.msk.f32.gmra.mrb[62].mxu1 %vm792_vm2, %v789_v62 }
 0x1ef   : > { %1133 = vmatprep.mubr.f32.mxu1 %v2309_v0 }
 0x1f2   : > { %1851 = vmatmul.mubr.msk.f32.gmra.mrb[64].mxu1 %vm792_vm2, %v790_v63 }
 0x1f3   : > { %1139 = vmatprep.mubr.f32.mxu1 %v2309_v0 }
 0x1f6   : > { %1852 = vmatmul.mubr.msk.f32.gmra.mrb[66].mxu1 %vm792_vm2, %v791_v1 }
 0x24d   : > { %v2548_v8 = vpop.f32.mrb[4].mxu1 }
 0x24e   : > { %v2550_v9 = vpop.f32.mrb[5].mxu1 }
 0x24f   : > { %v1146_v10 = vmax.f32 %v2548_v8, %v2550_v9 }
 0x251   : > { %1147 = vmax.xlane.f32.xlu0 %v1146_v10  ;;  %v2554_v11 = vpop.f32.mrb[6].mxu1 }
 0x252   : > { %v2556_v12 = vpop.f32.mrb[7].mxu1 }
 0x253   : > { %v1149_v13 = vmax.f32 %v2554_v11, %v2556_v12 }
 0x255   : > { %1150 = vmax.xlane.f32.xlu1 %v1149_v13  ;;  %v2560_v0 = vpop.f32.mrb[8].mxu1 }
 0x256   : > { %v2562_v14 = vpop.f32.mrb[9].mxu1 }
 0x257   : > { %v1152_v15 = vmax.f32 %v2560_v0, %v2562_v14 }
 0x259   : > { %1153 = vmax.xlane.f32.xlu1 %v1152_v15  ;;  %v2566_v16 = vpop.f32.mrb[10].mxu1 }
 0x25a   : > { %v2568_v17 = vpop.f32.mrb[11].mxu1 }
 0x25b   : > { %v1155_v18 = vmax.f32 %v2566_v16, %v2568_v17 }
 0x25d   : > { %1156 = vmax.xlane.f32.xlu1 %v1155_v18  ;;  %v2572_v19 = vpop.f32.mrb[12].mxu1 }
 0x25e   : > { %v2574_v20 = vpop.f32.mrb[13].mxu1 }
 0x25f   : > { %v1158_v21 = vmax.f32 %v2572_v19, %v2574_v20 }
 0x261   : > { %1159 = vmax.xlane.f32.xlu0 %v1158_v21  ;;  %v2578_v22 = vpop.f32.mrb[14].mxu1 }
 0x262   : > { %v2580_v23 = vpop.f32.mrb[15].mxu1 }
 0x263   : > { %v1161_v24 = vmax.f32 %v2578_v22, %v2580_v23 }
 0x265   : > { %1162 = vmax.xlane.f32.xlu1 %v1161_v24  ;;  %v2584_v25 = vpop.f32.mrb[16].mxu1 }
 0x266   : > { %v2586_v26 = vpop.f32.mrb[17].mxu1 }
 0x267   : > { %v1164_v27 = vmax.f32 %v2584_v25, %v2586_v26 }
 0x269   : > { %1165 = vmax.xlane.f32.xlu0 %v1164_v27  ;;  %v2590_v28 = vpop.f32.mrb[18].mxu1 }
 0x26a   : > { %v2592_v29 = vpop.f32.mrb[19].mxu1 }
 0x26b   : > { %v1167_v30 = vmax.f32 %v2590_v28, %v2592_v29 }
 0x26d   : > { %1168 = vmax.xlane.f32.xlu1 %v1167_v30  ;;  %v2596_v31 = vpop.f32.mrb[20].mxu1 }
 0x26e   : > { %v2598_v32 = vpop.f32.mrb[21].mxu1 }
 0x26f   : > { %v1170_v33 = vmax.f32 %v2596_v31, %v2598_v32 }
 0x271   : > { %1171 = vmax.xlane.f32.xlu0 %v1170_v33  ;;  %v2602_v34 = vpop.f32.mrb[22].mxu1 }
 0x272   : > { %v2604_v35 = vpop.f32.mrb[23].mxu1 }
 0x273   : > { %v1173_v36 = vmax.f32 %v2602_v34, %v2604_v35 }
 0x275   : > { %1174 = vmax.xlane.f32.xlu1 %v1173_v36  ;;  %v2608_v37 = vpop.f32.mrb[24].mxu1 }
 0x276   : > { %v2610_v38 = vpop.f32.mrb[25].mxu1 }
 0x277   : > { %v1176_v39 = vmax.f32 %v2608_v37, %v2610_v38 }
 0x279   : > { %1177 = vmax.xlane.f32.xlu0 %v1176_v39  ;;  %v2614_v40 = vpop.f32.mrb[26].mxu1 }
 0x27a   : > { %v2616_v41 = vpop.f32.mrb[27].mxu1 }
 0x27b   : > { %v1179_v42 = vmax.f32 %v2614_v40, %v2616_v41 }
 0x27d   : > { %1180 = vmax.xlane.f32.xlu1 %v1179_v42  ;;  %v2620_v43 = vpop.f32.mrb[28].mxu1 }
 0x27e   : > { %v2622_v44 = vpop.f32.mrb[29].mxu1 }
 0x27f   : > { %v1182_v45 = vmax.f32 %v2620_v43, %v2622_v44 }
 0x281   : > { %1183 = vmax.xlane.f32.xlu0 %v1182_v45  ;;  %v2626_v46 = vpop.f32.mrb[30].mxu1 }
 0x282   : > { %v2628_v47 = vpop.f32.mrb[31].mxu1 }
 0x283   : > { %v1185_v48 = vmax.f32 %v2626_v46, %v2628_v47 }
 0x285   : > { %1186 = vmax.xlane.f32.xlu1 %v1185_v48  ;;  %v2632_v49 = vpop.f32.mrb[32].mxu1 }
 0x286   : > { %v2634_v50 = vpop.f32.mrb[33].mxu1 }
 0x287   : > { %v1188_v51 = vmax.f32 %v2632_v49, %v2634_v50 }
 0x289   : > { %1189 = vmax.xlane.f32.xlu0 %v1188_v51  ;;  %v2638_v52 = vpop.f32.mrb[34].mxu1 }
 0x28a   : > { %v2640_v53 = vpop.f32.mrb[35].mxu1 }
 0x28b   : > { %v1191_v54 = vmax.f32 %v2638_v52, %v2640_v53 }
 0x28d   : > { %1192 = vmax.xlane.f32.xlu1 %v1191_v54  ;;  %v2644_v55 = vpop.f32.mrb[36].mxu1 }
 0x28e   : > { %v2646_v56 = vpop.f32.mrb[37].mxu1 }
 0x28f   : > { %v1194_v57 = vmax.f32 %v2644_v55, %v2646_v56 }
 0x291   : > { %1195 = vmax.xlane.f32.xlu0 %v1194_v57  ;;  %v2650_v58 = vpop.f32.mrb[38].mxu1 }
 0x292   : > { %v2652_v59 = vpop.f32.mrb[39].mxu1 }
 0x293   : > { %v1197_v60 = vmax.f32 %v2650_v58, %v2652_v59 }
 0x295   : > { %1198 = vmax.xlane.f32.xlu1 %v1197_v60  ;;  %v2656_v61 = vpop.f32.mrb[40].mxu1 }
 0x296   : > { %v2658_v62 = vpop.f32.mrb[41].mxu1 }
 0x297   : > { %v1200_v63 = vmax.f32 %v2656_v61, %v2658_v62 }
 0x299   : > { %1201 = vmax.xlane.f32.xlu0 %v1200_v63  ;;  %v2662_v1 = vpop.f32.mrb[42].mxu1 }
 0x29a   : > { %v2664_v2 = vpop.f32.mrb[43].mxu1 }
 0x29b   : > { %v1203_v3 = vmax.f32 %v2662_v1, %v2664_v2 }
 0x29d   : > { %1204 = vmax.xlane.f32.xlu1 %v1203_v3  ;;  %v2668_v4 = vpop.f32.mrb[44].mxu1 }
 0x29e   : > { %v2670_v5 = vpop.f32.mrb[45].mxu1 }
 0x29f   : > { %v1206_v6 = vmax.f32 %v2668_v4, %v2670_v5 }
 0x2a1   : > { %1207 = vmax.xlane.f32.xlu0 %v1206_v6  ;;  %v2674_v7 = vpop.f32.mrb[46].mxu1 }
 0x2a2   : > { %v2676_v10 = vpop.f32.mrb[47].mxu1 }
 0x2a3   : > { %v1209_v13 = vmax.f32 %v2674_v7, %v2676_v10 }
 0x2a5   : > { %1210 = vmax.xlane.f32.xlu1 %v1209_v13  ;;  %v2680_v15 = vpop.f32.mrb[48].mxu1 }
 0x2a6   : > { %v2682_v18 = vpop.f32.mrb[49].mxu1 }
 0x2a7   : > { %v1212_v21 = vmax.f32 %v2680_v15, %v2682_v18 }
 0x2a9   : > { %1213 = vmax.xlane.f32.xlu0 %v1212_v21  ;;  %v2686_v24 = vpop.f32.mrb[50].mxu1 }
 0x2aa   : > { %v2688_v27 = vpop.f32.mrb[51].mxu1 }
 0x2ab   : > { %v1215_v30 = vmax.f32 %v2686_v24, %v2688_v27 }
 0x2ad   : > { %1216 = vmax.xlane.f32.xlu1 %v1215_v30  ;;  %v2692_v33 = vpop.f32.mrb[52].mxu1 }
 0x2ae   : > { %v2694_v36 = vpop.f32.mrb[53].mxu1 }
 0x2af   : > { %v1218_v39 = vmax.f32 %v2692_v33, %v2694_v36 }
 0x2b1   : > { %1219 = vmax.xlane.f32.xlu0 %v1218_v39  ;;  %v2698_v42 = vpop.f32.mrb[54].mxu1 }
 0x2b2   : > { %2917 = vst [vmem:[#allocation6_spill] sm:$0xff] %v2698_v42  ;;  %v2700_v45 = vpop.f32.mrb[55].mxu1 }
 0x2b3   : > { %2918 = vst [vmem:[#allocation7_spill] sm:$0xff] %v2700_v45  ;;  %v1221_v48 = vmax.f32 %v2698_v42, %v2700_v45 }
 0x2b5   : > { %1222 = vmax.xlane.f32.xlu1 %v1221_v48  ;;  %v2704_v51 = vpop.f32.mrb[56].mxu1 }
 0x2b6   : > { %2919 = vst [vmem:[#allocation8_spill] sm:$0xff] %v2704_v51  ;;  %v2706_v54 = vpop.f32.mrb[57].mxu1 }
 0x2b7   : > { %2920 = vst [vmem:[#allocation9_spill] sm:$0xff] %v2706_v54  ;;  %v1224_v57 = vmax.f32 %v2704_v51, %v2706_v54 }
 0x2b9   : > { %1225 = vmax.xlane.f32.xlu0 %v1224_v57  ;;  %v2710_v60 = vpop.f32.mrb[58].mxu1 }
 0x2ba   : > { %2921 = vst [vmem:[#allocation10_spill] sm:$0xff] %v2710_v60  ;;  %v2712_v63 = vpop.f32.mrb[59].mxu1 }
 0x2bb   : > { %2922 = vst [vmem:[#allocation11_spill] sm:$0xff] %v2712_v63  ;;  %v1227_v3 = vmax.f32 %v2710_v60, %v2712_v63 }
 0x2bd   : > { %1228 = vmax.xlane.f32.xlu1 %v1227_v3  ;;  %v2716_v6 = vpop.f32.mrb[60].mxu1 }
 0x2be   : > { %2923 = vst [vmem:[#allocation12_spill] sm:$0xff] %v2716_v6  ;;  %v2718_v13 = vpop.f32.mrb[61].mxu1 }
 0x2bf   : > { %2924 = vst [vmem:[#allocation13_spill] sm:$0xff] %v2718_v13  ;;  %v1230_v21 = vmax.f32 %v2716_v6, %v2718_v13 }
 0x2c1   : > { %1231 = vmax.xlane.f32.xlu0 %v1230_v21  ;;  %v2722_v30 = vpop.f32.mrb[62].mxu1 }
 0x2c2   : > { %2925 = vst [vmem:[#allocation14_spill] sm:$0xff] %v2722_v30  ;;  %v2724_v39 = vpop.f32.mrb[63].mxu1 }
 0x2c3   : > { %2926 = vst [vmem:[#allocation15_spill] sm:$0xff] %v2724_v39  ;;  %v1233_v48 = vmax.f32 %v2722_v30, %v2724_v39 }
 0x2c5   : > { %1234 = vmax.xlane.f32.xlu1 %v1233_v48  ;;  %v2728_v57 = vpop.f32.mrb[64].mxu1 }
 0x2c6   : > { %2927 = vst [vmem:[#allocation16_spill] sm:$0xff] %v2728_v57  ;;  %v2730_v63 = vpop.f32.mrb[65].mxu1 }
 0x2c7   : > { %2928 = vst [vmem:[#allocation17_spill] sm:$0xff] %v2730_v63  ;;  %v1236_v3 = vmax.f32 %v2728_v57, %v2730_v63 }
 0x2c9   : > { %1237 = vmax.xlane.f32.xlu0 %v1236_v3  ;;  %v2734_v60 = vpop.f32.mrb[66].mxu1 }
 0x2ca   : > { %v2736_v13 = vpop.f32.mrb[67].mxu1 }
 0x2cb   : > { %2929 = vst [vmem:[#allocation18_spill] sm:$0xff] %v2736_v13  ;;  %v1239_v21 = vmax.f32 %v2734_v60, %v2736_v13 }
 0x2cd   : > { %1240 = vmax.xlane.f32.xlu1 %v1239_v21 }
 0x2de   : > { %v1148_v6 = vpop.xlane.xlu0 %1147 }
 0x2df   : > { %v1242_v39 = vsub.f32 %v2548_v8, %v1148_v6  ;;  %v1243_v48 = vsub.f32 %v2550_v9, %v1148_v6 }
 0x2e1   : > { %v1306_v30 = vmul.f32 1.442695, %v1242_v39  ;;  %v1308_v54 = vmul.f32 1.442695, %v1243_v48 }
 0x2e2   : > { %v1151_v51 = vpop.xlane.xlu1 %1150 }
 0x2e3   : > { %v1244_v45 = vsub.f32 %v2554_v11, %v1151_v51  ;;  %v1245_v3 = vsub.f32 %v2556_v12, %v1151_v51  ;;  %2081 = vpow2.f32 %v1306_v30  ;;  %v2751_v30 = vpop.f32.mrb[12].mxu0 }
 0x2e4   : > { %2083 = vpow2.f32 %v1308_v54 }
 0x2e5   : > { %v1310_v63 = vmul.f32 1.442695, %v1244_v45  ;;  %v1312_v57 = vmul.f32 1.442695, %v1245_v3 }
 0x2e6   : > { %v1154_v42 = vpop.xlane.xlu1 %1153 }
 0x2e7   : > { %2085 = vpow2.f32 %v1310_v63  ;;  %v1246_v21 = vsub.f32 %v2560_v0, %v1154_v42  ;;  %v1247_v13 = vsub.f32 %v2562_v14, %v1154_v42  ;;  %v2310_v14 = vmov 1.0  }
 0x2e8   : > { %2087 = vpow2.f32 %v1312_v57  ;;  %1498 = vmatprep.mubr.f32.mxu0 %v2310_v14 }
 0x2e9   : > { %v1314_v8 = vmul.f32 1.442695, %v1246_v21  ;;  %v1316_v9 = vmul.f32 1.442695, %v1247_v13  ;;  %v707_v21 = vpop.f32.mrb[13].mxu0 }
 0x2ea   : > { %v1157_v6 = vpop.xlane.xlu1 %1156  ;;  %1569 = vmatprep.mubr.f32.mxu1 %v707_v21 }
 0x2eb   : > { %v1248_v39 = vsub.f32 %v2566_v16, %v1157_v6  ;;  %v1249_v11 = vsub.f32 %v2568_v17, %v1157_v6  ;;  %2089 = vpow2.f32 %v1314_v8 }
 0x2ec   : > { %2091 = vpow2.f32 %v1316_v9 }
 0x2ed   : > { %v1318_v12 = vmul.f32 1.442695, %v1248_v39  ;;  %v1320_v51 = vmul.f32 1.442695, %v1249_v11  ;;  %v2082_v54 = vpop.eup %2081  ;;  %v2755_v39 = vpop.f32.mrb[14].mxu0 }
 0x2ee   : > { %v1160_v45 = vpop.xlane.xlu0 %1159  ;;  %v2084_v42 = vpop.eup %2083 }
 0x2ef   : > { %2093 = vpow2.f32 %v1318_v12  ;;  %v1250_v63 = vsub.f32 %v2572_v19, %v1160_v45  ;;  %v1251_v0 = vsub.f32 %v2574_v20, %v1160_v45  ;;  %v2757_v12 = vpop.f32.mrb[15].mxu0 }
 0x2f0   : > { %2095 = vpow2.f32 %v1320_v51 }
 0x2f1   : > { %v2086_v13 = vpop.eup %2085  ;;  %v1322_v16 = vmul.f32 1.442695, %v1250_v63  ;;  %v1324_v57 = vmul.f32 1.442695, %v1251_v0  ;;  %v2761_v0 = vpop.f32.mrb[16].mxu0 }
 0x2f2   : > { %v2088_v17 = vpop.eup %2087  ;;  %v1163_v48 = vpop.xlane.xlu1 %1162  ;;  %v1875_v3 = vpack.c.bf16 %v2086_v13, %v2082_v54 }
 0x2f3   : > { %v1252_v8 = vsub.f32 %v2578_v22, %v1163_v48  ;;  %v1253_v19 = vsub.f32 %v2580_v23, %v1163_v48  ;;  %v1873_v9 = vpack.c.bf16 %v2088_v17, %v2084_v42  ;;  %2097 = vpow2.f32 %v1322_v16 }
 0x2f4   : > { %2099 = vpow2.f32 %v1324_v57  ;;  %v2763_v57 = vpop.f32.mrb[17].mxu0 }
 0x2f5   : > { %v1326_v20 = vmul.f32 1.442695, %v1252_v8  ;;  %v1328_v6 = vmul.f32 1.442695, %v1253_v19  ;;  %1874 = vmatprep.subr.bf16.mxu0 %v1873_v9  ;;  %1938 = vmatprep.subr.bf16.mxu1 %v1873_v9  ;;  %v2090_v51 = vpop.eup %2089  ;;  %v2767_v8 = vpop.f32.mrb[18].mxu0 }
 0x2f6   : > { %1876 = vmatpush1.bf16.xpose.msra.mxu0 %v1875_v3  ;;  %1940 = vmatpush1.bf16.xpose.msra.mxu1 %v1875_v3  ;;  %v1166_v11 = vpop.xlane.xlu0 %1165  ;;  %v2092_v45 = vpop.eup %2091 }
 0x2f7   : > { %2101 = vpow2.f32 %v1326_v20  ;;  %v1254_v22 = vsub.f32 %v2584_v25, %v1166_v11  ;;  %v1255_v23 = vsub.f32 %v2586_v26, %v1166_v11  ;;  %v2769_v9 = vpop.f32.mrb[19].mxu0 }
 0x2f8   : > { %2103 = vpow2.f32 %v1328_v6 }
 0x2f9   : > { %v2094_v54 = vpop.eup %2093  ;;  %v1330_v63 = vmul.f32 1.442695, %v1254_v22  ;;  %v1332_v13 = vmul.f32 1.442695, %v1255_v23 }
 0x2fa   : > { %v2096_v42 = vpop.eup %2095  ;;  %v1169_v16 = vpop.xlane.xlu1 %1168  ;;  %v1879_v17 = vpack.c.bf16 %v2094_v54, %v2090_v51 }
 0x2fb   : > { %v1256_v48 = vsub.f32 %v2590_v28, %v1169_v16  ;;  %v1257_v3 = vsub.f32 %v2592_v29, %v1169_v16  ;;  %v1877_v21 = vpack.c.bf16 %v2096_v42, %v2092_v45  ;;  %2105 = vpow2.f32 %v1330_v63 }
 0x2fc   : > { %2107 = vpow2.f32 %v1332_v13 }
 0x2fd   : > { %v1334_v25 = vmul.f32 1.442695, %v1256_v48  ;;  %v1336_v26 = vmul.f32 1.442695, %v1257_v3  ;;  %1878 = vmatprep.subr.bf16.mxu0 %v1877_v21  ;;  %1942 = vmatprep.subr.bf16.mxu1 %v1877_v21  ;;  %v2098_v20 = vpop.eup %2097 }
 0x2fe   : > { %1880 = vmatpush1.bf16.xpose.msra.mxu0 %v1879_v17  ;;  %1944 = vmatpush1.bf16.xpose.msra.mxu1 %v1879_v17  ;;  %v1172_v19 = vpop.xlane.xlu0 %1171  ;;  %v2100_v6 = vpop.eup %2099 }
 0x2ff   : > { %2109 = vpow2.f32 %v1334_v25  ;;  %v1258_v28 = vsub.f32 %v2596_v31, %v1172_v19  ;;  %v1259_v29 = vsub.f32 %v2598_v32, %v1172_v19 }
 0x300   : > { %2111 = vpow2.f32 %v1336_v26 }
 0x301   : > { %v2102_v11 = vpop.eup %2101  ;;  %v1338_v51 = vmul.f32 1.442695, %v1258_v28  ;;  %v1340_v23 = vmul.f32 1.442695, %v1259_v29 }
 0x302   : > { %v2104_v22 = vpop.eup %2103  ;;  %v1175_v45 = vpop.xlane.xlu1 %1174  ;;  %v1883_v54 = vpack.c.bf16 %v2102_v11, %v2098_v20 }
 0x303   : > { %v1260_v63 = vsub.f32 %v2602_v34, %v1175_v45  ;;  %v1261_v42 = vsub.f32 %v2604_v35, %v1175_v45  ;;  %v1881_v13 = vpack.c.bf16 %v2104_v22, %v2100_v6  ;;  %2113 = vpow2.f32 %v1338_v51 }
 0x304   : > { %2115 = vpow2.f32 %v1340_v23 }
 0x305   : > { %v1342_v16 = vmul.f32 1.442695, %v1260_v63  ;;  %v1344_v17 = vmul.f32 1.442695, %v1261_v42  ;;  %1882 = vmatprep.subr.bf16.mxu0 %v1881_v13  ;;  %1946 = vmatprep.subr.bf16.mxu1 %v1881_v13  ;;  %v2106_v32 = vpop.eup %2105 }
 0x306   : > { %1884 = vmatpush1.bf16.xpose.msra.mxu0 %v1883_v54  ;;  %1948 = vmatpush1.bf16.xpose.msra.mxu1 %v1883_v54  ;;  %v1178_v31 = vpop.xlane.xlu0 %1177  ;;  %v2108_v21 = vpop.eup %2107 }
 0x307   : > { %2117 = vpow2.f32 %v1342_v16  ;;  %v1262_v48 = vsub.f32 %v2608_v37, %v1178_v31  ;;  %v1263_v3 = vsub.f32 %v2610_v38, %v1178_v31 }
 0x308   : > { %2119 = vpow2.f32 %v1344_v17 }
 0x309   : > { %v2110_v34 = vpop.eup %2109  ;;  %v1346_v35 = vmul.f32 1.442695, %v1262_v48  ;;  %v1348_v26 = vmul.f32 1.442695, %v1263_v3 }
 0x30a   : > { %v2112_v25 = vpop.eup %2111  ;;  %v1181_v19 = vpop.xlane.xlu1 %1180  ;;  %v1887_v20 = vpack.c.bf16 %v2110_v34, %v2106_v32 }
 0x30b   : > { %v1264_v28 = vsub.f32 %v2614_v40, %v1181_v19  ;;  %v1265_v29 = vsub.f32 %v2616_v41, %v1181_v19  ;;  %v1885_v6 = vpack.c.bf16 %v2112_v25, %v2108_v21  ;;  %2121 = vpow2.f32 %v1346_v35 }
 0x30c   : > { %2123 = vpow2.f32 %v1348_v26 }
 0x30d   : > { %v1350_v11 = vmul.f32 1.442695, %v1264_v28  ;;  %v1352_v51 = vmul.f32 1.442695, %v1265_v29  ;;  %1886 = vmatprep.subr.bf16.mxu0 %v1885_v6  ;;  %1950 = vmatprep.subr.bf16.mxu1 %v1885_v6  ;;  %v2114_v38 = vpop.eup %2113 }
 0x30e   : > { %1888 = vmatpush1.bf16.xpose.msra.mxu0 %v1887_v20  ;;  %1952 = vmatpush1.bf16.xpose.msra.mxu1 %v1887_v20  ;;  %v1184_v37 = vpop.xlane.xlu0 %1183  ;;  %v2116_v45 = vpop.eup %2115 }
 0x30f   : > { %2125 = vpow2.f32 %v1350_v11  ;;  %v1266_v22 = vsub.f32 %v2620_v43, %v1184_v37  ;;  %v1267_v23 = vsub.f32 %v2622_v44, %v1184_v37 }
 0x310   : > { %2127 = vpow2.f32 %v1352_v51 }
 0x311   : > { %v2118_v40 = vpop.eup %2117  ;;  %v1354_v41 = vmul.f32 1.442695, %v1266_v22  ;;  %v1356_v63 = vmul.f32 1.442695, %v1267_v23 }
 0x312   : > { %v2120_v54 = vpop.eup %2119  ;;  %v1187_v42 = vpop.xlane.xlu1 %1186  ;;  %v1891_v13 = vpack.c.bf16 %v2118_v40, %v2114_v38 }
 0x313   : > { %v1268_v16 = vsub.f32 %v2626_v46, %v1187_v42  ;;  %v1269_v17 = vsub.f32 %v2628_v47, %v1187_v42  ;;  %v1889_v31 = vpack.c.bf16 %v2120_v54, %v2116_v45  ;;  %2129 = vpow2.f32 %v1354_v41 }
 0x314   : > { %2131 = vpow2.f32 %v1356_v63 }
 0x315   : > { %v1358_v32 = vmul.f32 1.442695, %v1268_v16  ;;  %v1360_v48 = vmul.f32 1.442695, %v1269_v17  ;;  %1890 = vmatprep.subr.bf16.mxu0 %v1889_v31  ;;  %1954 = vmatprep.subr.bf16.mxu1 %v1889_v31  ;;  %v2122_v44 = vpop.eup %2121 }
 0x316   : > { %1892 = vmatpush1.bf16.xpose.msra.mxu0 %v1891_v13  ;;  %1956 = vmatpush1.bf16.xpose.msra.mxu1 %v1891_v13  ;;  %v1190_v43 = vpop.xlane.xlu0 %1189  ;;  %v2124_v34 = vpop.eup %2123 }
 0x317   : > { %2133 = vpow2.f32 %v1358_v32  ;;  %v1270_v3 = vsub.f32 %v2632_v49, %v1190_v43  ;;  %v1271_v21 = vsub.f32 %v2634_v50, %v1190_v43 }
 0x318   : > { %2135 = vpow2.f32 %v1360_v48 }
 0x319   : > { %v2126_v46 = vpop.eup %2125  ;;  %v1362_v47 = vmul.f32 1.442695, %v1270_v3  ;;  %v1364_v25 = vmul.f32 1.442695, %v1271_v21 }
 0x31a   : > { %v2128_v35 = vpop.eup %2127  ;;  %v1193_v26 = vpop.xlane.xlu1 %1192  ;;  %v1895_v19 = vpack.c.bf16 %v2126_v46, %v2122_v44 }
 0x31b   : > { %v1272_v20 = vsub.f32 %v2638_v52, %v1193_v26  ;;  %v1273_v28 = vsub.f32 %v2640_v53, %v1193_v26  ;;  %v1893_v29 = vpack.c.bf16 %v2128_v35, %v2124_v34  ;;  %2137 = vpow2.f32 %v1362_v47 }
 0x31c   : > { %2139 = vpow2.f32 %v1364_v25 }
 0x31d   : > { %v1366_v6 = vmul.f32 1.442695, %v1272_v20  ;;  %v1368_v11 = vmul.f32 1.442695, %v1273_v28  ;;  %1894 = vmatprep.subr.bf16.mxu0 %v1893_v29  ;;  %1958 = vmatprep.subr.bf16.mxu1 %v1893_v29  ;;  %v2130_v50 = vpop.eup %2129 }
 0x31e   : > { %1896 = vmatpush1.bf16.xpose.msra.mxu0 %v1895_v19  ;;  %1960 = vmatpush1.bf16.xpose.msra.mxu1 %v1895_v19  ;;  %v1196_v49 = vpop.xlane.xlu0 %1195  ;;  %v2132_v38 = vpop.eup %2131 }
 0x31f   : > { %2141 = vpow2.f32 %v1366_v6  ;;  %v1274_v51 = vsub.f32 %v2644_v55, %v1196_v49  ;;  %v1275_v37 = vsub.f32 %v2646_v56, %v1196_v49 }
 0x320   : > { %2143 = vpow2.f32 %v1368_v11 }
 0x321   : > { %v2134_v52 = vpop.eup %2133  ;;  %v1370_v53 = vmul.f32 1.442695, %v1274_v51  ;;  %v1372_v23 = vmul.f32 1.442695, %v1275_v37 }
 0x322   : > { %v2136_v22 = vpop.eup %2135  ;;  %v1199_v45 = vpop.xlane.xlu1 %1198  ;;  %v1899_v40 = vpack.c.bf16 %v2134_v52, %v2130_v50 }
 0x323   : > { %v1276_v41 = vsub.f32 %v2650_v58, %v1199_v45  ;;  %v1277_v54 = vsub.f32 %v2652_v59, %v1199_v45  ;;  %v1897_v63 = vpack.c.bf16 %v2136_v22, %v2132_v38  ;;  %2145 = vpow2.f32 %v1370_v53 }
 0x324   : > { %2147 = vpow2.f32 %v1372_v23 }
 0x325   : > { %v1374_v42 = vmul.f32 1.442695, %v1276_v41  ;;  %v1376_v13 = vmul.f32 1.442695, %v1277_v54  ;;  %1898 = vmatprep.subr.bf16.mxu0 %v1897_v63  ;;  %1962 = vmatprep.subr.bf16.mxu1 %v1897_v63  ;;  %v2138_v56 = vpop.eup %2137 }
 0x326   : > { %1900 = vmatpush1.bf16.xpose.msra.mxu0 %v1899_v40  ;;  %1964 = vmatpush1.bf16.xpose.msra.mxu1 %v1899_v40  ;;  %v1202_v55 = vpop.xlane.xlu0 %1201  ;;  %v2140_v31 = vpop.eup %2139 }
 0x327   : > { %2149 = vpow2.f32 %v1374_v42  ;;  %v1278_v16 = vsub.f32 %v2656_v61, %v1202_v55  ;;  %v1279_v17 = vsub.f32 %v2658_v62, %v1202_v55 }
 0x328   : > { %2151 = vpow2.f32 %v1376_v13 }
 0x329   : > { %v2142_v58 = vpop.eup %2141  ;;  %v1378_v59 = vmul.f32 1.442695, %v1278_v16  ;;  %v1380_v48 = vmul.f32 1.442695, %v1279_v17 }
 0x32a   : > { %v2144_v32 = vpop.eup %2143  ;;  %v1205_v43 = vpop.xlane.xlu1 %1204  ;;  %v1903_v44 = vpack.c.bf16 %v2142_v58, %v2138_v56 }
 0x32b   : > { %v1280_v3 = vsub.f32 %v2662_v1, %v1205_v43  ;;  %v1281_v21 = vsub.f32 %v2664_v2, %v1205_v43  ;;  %v1901_v34 = vpack.c.bf16 %v2144_v32, %v2140_v31  ;;  %2153 = vpow2.f32 %v1378_v59  ;;  %v2930_v59 = vld [vmem:[#allocation6_spill] sm:$0xff] }
 0x32c   : > { %2155 = vpow2.f32 %v1380_v48  ;;  %v2931_v48 = vld [vmem:[#allocation7_spill] sm:$0xff] }
 0x32d   : > { %v1382_v46 = vmul.f32 1.442695, %v1280_v3  ;;  %v1384_v47 = vmul.f32 1.442695, %v1281_v21  ;;  %1902 = vmatprep.subr.bf16.mxu0 %v1901_v34  ;;  %1966 = vmatprep.subr.bf16.mxu1 %v1901_v34  ;;  %v2146_v62 = vpop.eup %2145  ;;  %v2932_v34 = vld [vmem:[#allocation8_spill] sm:$0xff] }
 0x32e   : > { %1904 = vmatpush1.bf16.xpose.msra.mxu0 %v1903_v44  ;;  %1968 = vmatpush1.bf16.xpose.msra.mxu1 %v1903_v44  ;;  %v1208_v61 = vpop.xlane.xlu0 %1207  ;;  %v2148_v26 = vpop.eup %2147 }
 0x32f   : > { %2157 = vpow2.f32 %v1382_v46  ;;  %v1282_v35 = vsub.f32 %v2668_v4, %v1208_v61  ;;  %v1283_v25 = vsub.f32 %v2670_v5, %v1208_v61 }
 0x330   : > { %2159 = vpow2.f32 %v1384_v47  ;;  %v2933_v47 = vld [vmem:[#allocation9_spill] sm:$0xff] }
 0x331   : > { %v2150_v1 = vpop.eup %2149  ;;  %v1386_v2 = vmul.f32 1.442695, %v1282_v35  ;;  %v1388_v20 = vmul.f32 1.442695, %v1283_v25 }
 0x332   : > { %v2152_v19 = vpop.eup %2151  ;;  %v1211_v28 = vpop.xlane.xlu1 %1210  ;;  %v1907_v29 = vpack.c.bf16 %v2150_v1, %v2146_v62 }
 0x333   : > { %v1284_v6 = vsub.f32 %v2674_v7, %v1211_v28  ;;  %v1285_v11 = vsub.f32 %v2676_v10, %v1211_v28  ;;  %v1905_v49 = vpack.c.bf16 %v2152_v19, %v2148_v26  ;;  %2161 = vpow2.f32 %v1386_v2 }
 0x334   : > { %2163 = vpow2.f32 %v1388_v20  ;;  %v2934_v20 = vld [vmem:[#allocation10_spill] sm:$0xff] }
 0x335   : > { %v1390_v50 = vmul.f32 1.442695, %v1284_v6  ;;  %v1392_v51 = vmul.f32 1.442695, %v1285_v11  ;;  %1906 = vmatprep.subr.bf16.mxu0 %v1905_v49  ;;  %1970 = vmatprep.subr.bf16.mxu1 %v1905_v49  ;;  %v2154_v5 = vpop.eup %2153 }
 0x336   : > { %1908 = vmatpush1.bf16.xpose.msra.mxu0 %v1907_v29  ;;  %1972 = vmatpush1.bf16.xpose.msra.mxu1 %v1907_v29  ;;  %v1214_v4 = vpop.xlane.xlu0 %1213  ;;  %v2156_v52 = vpop.eup %2155  ;;  %v2935_v29 = vld [vmem:[#allocation11_spill] sm:$0xff] }
 0x337   : > { %2165 = vpow2.f32 %v1390_v50  ;;  %v1286_v37 = vsub.f32 %v2680_v15, %v1214_v4  ;;  %v1287_v38 = vsub.f32 %v2682_v18, %v1214_v4 }
 0x338   : > { %2167 = vpow2.f32 %v1392_v51 }
 0x339   : > { %v2158_v7 = vpop.eup %2157  ;;  %v1394_v10 = vmul.f32 1.442695, %v1286_v37  ;;  %v1396_v22 = vmul.f32 1.442695, %v1287_v38  ;;  %v2937_v38 = vld [vmem:[#allocation13_spill] sm:$0xff] }
 0x33a   : > { %v2160_v53 = vpop.eup %2159  ;;  %v1217_v23 = vpop.xlane.xlu1 %1216  ;;  %v1911_v45 = vpack.c.bf16 %v2158_v7, %v2154_v5  ;;  %v2936_v5 = vld [vmem:[#allocation12_spill] sm:$0xff] }
 0x33b   : > { %v1288_v40 = vsub.f32 %v2686_v24, %v1217_v23  ;;  %v1289_v41 = vsub.f32 %v2688_v27, %v1217_v23  ;;  %v1909_v54 = vpack.c.bf16 %v2160_v53, %v2156_v52  ;;  %2169 = vpow2.f32 %v1394_v10 }
 0x33c   : > { %2171 = vpow2.f32 %v1396_v22 }
 0x33d   : > { %v1398_v63 = vmul.f32 1.442695, %v1288_v40  ;;  %v1400_v42 = vmul.f32 1.442695, %v1289_v41  ;;  %1910 = vmatprep.subr.bf16.mxu0 %v1909_v54  ;;  %1974 = vmatprep.subr.bf16.mxu1 %v1909_v54  ;;  %v2162_v18 = vpop.eup %2161  ;;  %v2938_v41 = vld [vmem:[#allocation14_spill] sm:$0xff] }
 0x33e   : > { %1912 = vmatpush1.bf16.xpose.msra.mxu0 %v1911_v45  ;;  %1976 = vmatpush1.bf16.xpose.msra.mxu1 %v1911_v45  ;;  %v1220_v15 = vpop.xlane.xlu0 %1219  ;;  %v2164_v56 = vpop.eup %2163 }
 0x33f   : > { %2173 = vpow2.f32 %v1398_v63  ;;  %v1290_v13 = vsub.f32 %v2692_v33, %v1220_v15  ;;  %v1291_v55 = vsub.f32 %v2694_v36, %v1220_v15  ;;  %v2939_v63 = vld [vmem:[#allocation15_spill] sm:$0xff] }
 0x340   : > { %2175 = vpow2.f32 %v1400_v42 }
 0x341   : > { %v2166_v24 = vpop.eup %2165  ;;  %v1402_v27 = vmul.f32 1.442695, %v1290_v13  ;;  %v1404_v17 = vmul.f32 1.442695, %v1291_v55 }
 0x342   : > { %v2168_v16 = vpop.eup %2167  ;;  %v1223_v31 = vpop.xlane.xlu1 %1222  ;;  %v1915_v58 = vpack.c.bf16 %v2166_v24, %v2162_v18  ;;  %v2940_v24 = vld [vmem:[#allocation16_spill] sm:$0xff] }
 0x343   : > { %v1292_v32 = vsub.f32 %v2930_v59, %v1223_v31  ;;  %v1293_v43 = vsub.f32 %v2931_v48, %v1223_v31  ;;  %v1913_v44 = vpack.c.bf16 %v2168_v16, %v2164_v56  ;;  %2177 = vpow2.f32 %v1402_v27  ;;  %v2941_v16 = vld [vmem:[#allocation17_spill] sm:$0xff] }
 0x344   : > { %2179 = vpow2.f32 %v1404_v17 }
 0x345   : > { %v1406_v3 = vmul.f32 1.442695, %v1292_v32  ;;  %v1408_v21 = vmul.f32 1.442695, %v1293_v43  ;;  %1914 = vmatprep.subr.bf16.mxu0 %v1913_v44  ;;  %1978 = vmatprep.subr.bf16.mxu1 %v1913_v44  ;;  %v2170_v36 = vpop.eup %2169 }
 0x346   : > { %1916 = vmatpush1.bf16.xpose.msra.mxu0 %v1915_v58  ;;  %1980 = vmatpush1.bf16.xpose.msra.mxu1 %v1915_v58  ;;  %v1226_v33 = vpop.xlane.xlu0 %1225  ;;  %v2172_v62 = vpop.eup %2171 }
 0x347   : > { %2181 = vpow2.f32 %v1406_v3  ;;  %v1294_v46 = vsub.f32 %v2932_v34, %v1226_v33  ;;  %v1295_v61 = vsub.f32 %v2933_v47, %v1226_v33 }
 0x348   : > { %2183 = vpow2.f32 %v1408_v21  ;;  %v2942_v21 = vld [vmem:[#allocation18_spill] sm:$0xff] }
 0x349   : > { %v2174_v35 = vpop.eup %2173  ;;  %v1410_v25 = vmul.f32 1.442695, %v1294_v46  ;;  %v1412_v1 = vmul.f32 1.442695, %v1295_v61 }
 0x34a   : > { %v2176_v26 = vpop.eup %2175  ;;  %v1229_v2 = vpop.xlane.xlu1 %1228  ;;  %v1919_v19 = vpack.c.bf16 %v2174_v35, %v2170_v36 }
 0x34b   : > { %v1296_v28 = vsub.f32 %v2934_v20, %v1229_v2  ;;  %v1297_v6 = vsub.f32 %v2935_v29, %v1229_v2  ;;  %v1917_v11 = vpack.c.bf16 %v2176_v26, %v2172_v62  ;;  %2185 = vpow2.f32 %v1410_v25 }
 0x34c   : > { %2187 = vpow2.f32 %v1412_v1 }
 0x34d   : > { %v1414_v49 = vmul.f32 1.442695, %v1296_v28  ;;  %v1416_v50 = vmul.f32 1.442695, %v1297_v6  ;;  %1918 = vmatprep.subr.bf16.mxu0 %v1917_v11  ;;  %1982 = vmatprep.subr.bf16.mxu1 %v1917_v11  ;;  %v2178_v4 = vpop.eup %2177 }
 0x34e   : > { %1920 = vmatpush1.bf16.xpose.msra.mxu0 %v1919_v19  ;;  %1984 = vmatpush1.bf16.xpose.msra.mxu1 %v1919_v19  ;;  %v1232_v51 = vpop.xlane.xlu0 %1231  ;;  %v2180_v7 = vpop.eup %2179 }
 0x34f   : > { %2189 = vpow2.f32 %v1414_v49  ;;  %v1298_v37 = vsub.f32 %v2936_v5, %v1232_v51  ;;  %v1299_v52 = vsub.f32 %v2937_v38, %v1232_v51 }
 0x350   : > { %2191 = vpow2.f32 %v1416_v50 }
 0x351   : > { %v2182_v10 = vpop.eup %2181  ;;  %v1418_v53 = vmul.f32 1.442695, %v1298_v37  ;;  %v1420_v23 = vmul.f32 1.442695, %v1299_v52 }
 0x352   : > { %v2184_v22 = vpop.eup %2183  ;;  %v1235_v45 = vpop.xlane.xlu1 %1234  ;;  %v1923_v40 = vpack.c.bf16 %v2182_v10, %v2178_v4 }
 0x353   : > { %v1300_v54 = vsub.f32 %v2938_v41, %v1235_v45  ;;  %v1301_v42 = vsub.f32 %v2939_v63, %v1235_v45  ;;  %v1921_v15 = vpack.c.bf16 %v2184_v22, %v2180_v7  ;;  %2193 = vpow2.f32 %v1418_v53 }
 0x354   : > { %2195 = vpow2.f32 %v1420_v23 }
 0x355   : > { %v1422_v18 = vmul.f32 1.442695, %v1300_v54  ;;  %v1424_v13 = vmul.f32 1.442695, %v1301_v42  ;;  %1922 = vmatprep.subr.bf16.mxu0 %v1921_v15  ;;  %1986 = vmatprep.subr.bf16.mxu1 %v1921_v15  ;;  %v2186_v56 = vpop.eup %2185 }
 0x356   : > { %1924 = vmatpush1.bf16.xpose.msra.mxu0 %v1923_v40  ;;  %1988 = vmatpush1.bf16.xpose.msra.mxu1 %v1923_v40  ;;  %v1238_v55 = vpop.xlane.xlu0 %1237  ;;  %v2188_v31 = vpop.eup %2187 }
 0x357   : > { %2197 = vpow2.f32 %v1422_v18  ;;  %v1302_v27 = vsub.f32 %v2940_v24, %v1238_v55  ;;  %v1303_v17 = vsub.f32 %v2941_v16, %v1238_v55 }
 0x358   : > { %2199 = vpow2.f32 %v1424_v13 }
 0x359   : > { %v2190_v58 = vpop.eup %2189  ;;  %v1426_v59 = vmul.f32 1.442695, %v1302_v27  ;;  %v1428_v48 = vmul.f32 1.442695, %v1303_v17 }
 0x35a   : > { %v2192_v32 = vpop.eup %2191  ;;  %v1241_v43 = vpop.xlane.xlu1 %1240  ;;  %v1927_v44 = vpack.c.bf16 %v2190_v58, %v2186_v56 }
 0x35b   : > { %v1304_v3 = vsub.f32 %v2734_v60, %v1241_v43  ;;  %v1305_v33 = vsub.f32 %v2942_v21, %v1241_v43  ;;  %v1925_v36 = vpack.c.bf16 %v2192_v32, %v2188_v31  ;;  %2201 = vpow2.f32 %v1426_v59 }
 0x35c   : > { %2203 = vpow2.f32 %v1428_v48 }
 0x35d   : > { %v1430_v34 = vmul.f32 1.442695, %v1304_v3  ;;  %v1432_v46 = vmul.f32 1.442695, %v1305_v33  ;;  %1926 = vmatprep.subr.bf16.mxu0 %v1925_v36  ;;  %1990 = vmatprep.subr.bf16.mxu1 %v1925_v36  ;;  %v2194_v47 = vpop.eup %2193 }
 0x35e   : > { %1928 = vmatpush1.bf16.xpose.msra.mxu0 %v1927_v44  ;;  %1992 = vmatpush1.bf16.xpose.msra.mxu1 %v1927_v44  ;;  %v2196_v61 = vpop.eup %2195 }
 0x35f   : > { %2205 = vpow2.f32 %v1430_v34 }
 0x360   : > { %2207 = vpow2.f32 %v1432_v46 }
 0x361   : > { %v2198_v62 = vpop.eup %2197 }
 0x362   : > { %v2200_v35 = vpop.eup %2199  ;;  %v1931_v25 = vpack.c.bf16 %v2198_v62, %v2194_v47 }
 0x363   : > { %v1929_v26 = vpack.c.bf16 %v2200_v35, %v2196_v61 }
 0x365   : > { %1930 = vmatprep.subr.bf16.mxu0 %v1929_v26  ;;  %1994 = vmatprep.subr.bf16.mxu1 %v1929_v26  ;;  %v2202_v60 = vpop.eup %2201 }
 0x366   : > { %1932 = vmatpush1.bf16.xpose.msra.mxu0 %v1931_v25  ;;  %1996 = vmatpush1.bf16.xpose.msra.mxu1 %v1931_v25  ;;  %v2204_v1 = vpop.eup %2203 }
 0x369   : > { %v2206_v2 = vpop.eup %2205 }
 0x36a   : > { %v2208_v19 = vpop.eup %2207  ;;  %v1935_v20 = vpack.c.bf16 %v2206_v2, %v2202_v60 }
 0x36b   : > { %v1933_v28 = vpack.c.bf16 %v2208_v19, %v2204_v1 }
 0x36d   : > { %1934 = vmatprep.subr.bf16.mxu0 %v1933_v28  ;;  %1998 = vmatprep.subr.bf16.mxu1 %v1933_v28 }
 0x36e   : > { %1936 = vmatpush1.bf16.xpose.msra.mxu0 %v1935_v20  ;;  %2000 = vmatpush1.bf16.xpose.msra.mxu1 %v1935_v20 }
 0x375   : > { %1499 = vmatmul.mubr.f32.vlgmr.msra.gmra.mrb[20].mxu0 %v2310_v14  ;;  %1570 = vmatmul.mubr.f32.vlgmr.msra.gmra.mrb[68].mxu1 %v2751_v30  ;;  %v1596_v14 = vlaneseq }
 0x376   : > { %1575 = vmatprep.mubr.f32.mxu1 %v2757_v12 }
 0x379   : > { %1576 = vmatmul.mubr.f32.gmra.mrb[70].mxu1 %v2755_v39  ;;  %v1597_v39 = vshrl.u32 %v1596_v14, 7 }
 0x37a   : > { %1581 = vmatprep.mubr.f32.mxu1 %v2763_v57 }
 0x37d   : > { %1582 = vmatmul.mubr.f32.gmra.mrb[72].mxu1 %v2761_v0  ;;  %v1598_v0 = vsub.s32 0, %v1597_v39 }
 0x37e   : > { %1587 = vmatprep.mubr.f32.mxu1 %v2769_v9 }
 0x381   : > { %1588 = vmatmul.mubr.f32.gmra.mrb[74].mxu1 %v2767_v8 }
 0x448   : > { %v1500_v29 = vpop.f32.mrb[20].mxu0  ;;  %v1571_v6 = vpop.f32.mrb[68].mxu1 }
 0x449   : > { %2209 = vrcp.f32 %v1500_v29  ;;  %v1502_v30 = vpop.f32.mrb[21].mxu0  ;;  %v1573_v11 = vpop.f32.mrb[69].mxu1 }
 0x44a   : > { %2211 = vrcp.f32 %v1502_v30 }
 0x44c   : > { %v1577_v12 = vpop.f32.mrb[70].mxu1 }
 0x44d   : > { %v1579_v57 = vpop.f32.mrb[71].mxu1 }
 0x450   : > { %v1583_v49 = vpop.f32.mrb[72].mxu1 }
 0x451   : > { %v1585_v9 = vpop.f32.mrb[73].mxu1 }
 0x453   : > { %v2210_v8 = vpop.eup %2209 }
 0x454   : > { %v2212_v50 = vpop.eup %2211  ;;  %v1599_v51 = vrot.slane %v2210_v8, %v1598_v0  ;;  %v1589_v4 = vpop.f32.mrb[74].mxu1 }
 0x455   : > { %v1603_v5 = vrot.slane %v2212_v50, %v1598_v0  ;;  %v1591_v37 = vpop.f32.mrb[75].mxu1 }
 0x456   : > { %v1604_v38 = vmul.f32 %v1599_v51, %v1571_v6  ;;  %v1606_v52 = vmul.f32 %v1599_v51, %v1577_v12  ;;  %v1608_v7 = vmul.f32 %v1599_v51, %v1583_v49  ;;  %v1610_v10 = vmul.f32 %v1599_v51, %v1589_v4 }
 0x457   : > { %v1605_v53 = vmul.f32 %v1603_v5, %v1573_v11  ;;  %v1607_v22 = vmul.f32 %v1603_v5, %v1579_v57  ;;  %v1609_v23 = vmul.f32 %v1603_v5, %v1585_v9  ;;  %v1611_v45 = vmul.f32 %v1603_v5, %v1591_v37 }
 0x458   : > { %1612 = vst [vmem:[%s353_s8] sm:$0xff] %v1604_v38  ;;  %1614 = vst [vmem:[%s353_s8 + $0x10] sm:$0xff] %v1606_v52 }
 0x459   : > { %1616 = vst [vmem:[%s353_s8 + $0x20] sm:$0xff] %v1608_v7  ;;  %1618 = vst [vmem:[%s353_s8 + $0x30] sm:$0xff] %v1610_v10 }
 0x45a   : > { %1613 = vst [vmem:[%s353_s8 + $0x8] sm:$0xff] %v1605_v53  ;;  %1615 = vst [vmem:[%s353_s8 + $0x18] sm:$0xff] %v1607_v22 }
 0x45b   : > { %1617 = vst [vmem:[%s353_s8 + $0x28] sm:$0xff] %v1609_v23  ;;  %1619 = vst [vmem:[%s353_s8 + $0x38] sm:$0xff] %v1611_v45 }
 0x45c   : > { %2226 = shalt.err (!%p2223_p7)
}
 0x45d   : > { %s2227_s18 = scalar_lea.hbm %s2835_s30, 1024  ;;  %s2231_s29 = scalar_lea.hbm %s2899_s6, 4096 }
 0x45e   : > { %p2228_p9 = scmp.ne.s32.totalorder %s2835_s30, %s2227_s18  ;;  %p2232_p12 = scmp.lt.u32.totalorder %s2835_s30, %s2899_s6 }
 0x45f   : > { %p2233_p13 = scmp.lt.u32.totalorder %s2231_s29, %s2227_s18  ;;  %p2235_p1 = scmp.lt.u32.totalorder %s2227_s18, %s2835_s30 }
 0x460   : > { %p2229_p10 = pnand %p2228_p9, %p2400_p3 }
 0x461   : > { %p2234_p0 = por %p2233_p13, %p2232_p12 }
 0x462   : > { %p2230_p11 = pneg %p2229_p10 }
 0x463   : > { %p2236_p2 = por %p2235_p1, %p2234_p0 }
 0x465   : > { %p2237_p4 = pnand %p2236_p2, %p2230_p11 }
 0x467   : > { %2240 = shalt.err (!%p2237_p4)
}
 0x468   : > { %s2312_s25 = smov 256   ;;  %s2313_s12 = smov 16  }
 0x469   : > { %2003 = dma.vmem_to_hbm [thread:$0]  (%p2400_p3), %s2837_s17, 1024, %s2835_s30, %s2841_s9, %s2312_s25, %s2312_s25, %s2313_s12  }
 0x46a PF: > { %p2009_p5 = scmp.ge.s32.totalorder %s2307_s28, 2  ;;  %s1653_s14 = sand.u32 1, %s2279_s21  }
 0x46b   : > { %s1654_s13 = scalar_lea.sflag [#allocation3], %s1653_s14 }
 0x46c   : > { %p2006_p6 = pnand %p2009_p5, %p2409_p8 }
 0x46e   : > { %2274 = dma.done.wait (!%p2006_p6), %s1654_s13, 1024  }
 0x46f   : > { %2276 = vsyncadd (!%p2006_p6), %s1654_s13, 4294966272  ;;  %s19_s28 = sadd.s32 1, %s2307_s28   ;;  %s2943_s10 = sld [smem:[#allocation5_spill]] }
 0x470   : > { %p16_p7 = scmp.ge.s32.totalorder %s19_s28, 6   ;;  %s2944_s21 = smov %s2283_s22 }
 0x471   : > { %s2945_s22 = smov %s2287_s23  ;;  %s2946_s23 = smov %s2418_s15 }
 0x472   : > { %s2947_s24 = smov %s2299_s26  ;;  %s2948_s25 = smov %s2303_s27 }
 0x473   : > { %s2949_s26 = smov %s2952_s7  ;;  %18 = sbr.rel (!%p16_p7) target bundleno = 5 (0x5), region = 94 }
 0x475   : > { %s2950_s27 = smov %s2943_s10 }
 0x47a   :  { %1659 = vsyncpa [#allocation3], 1 }
 0x47b   :  { %1661 = vsyncpa [#allocation3 + $0x1], 1 }

</bundles_post_ra>
